<compile_context>
chip_gen: v6e
topology: v6e:2x2x1
jax: 0.10.0
libtpu: 0.0.40
codegen_flags: <defaults>
</compile_context>

<pallas_src>
import functools

import jax
import jax.numpy as jnp
from jax.experimental import pallas as pl
from jax.experimental.pallas import tpu as pltpu


def _round_up(x, m):
    return (x + m - 1) // m * m


def _pad_to_kernel(x_ref, o_ref, *, top, left, row_chunk):
    """Zero-pad one channel tile.

    The output is covered by row chunks of `row_chunk` rows (sublane-aligned
    starts).  Each chunk is built in-register as zeros|x|zeros (rows and
    lanes) and stored exactly once.
    """
    ct, h, w = x_ref.shape
    _, h_out, w_out = o_ref.shape
    dt = o_ref.dtype
    right = w_out - left - w

    for r0 in range(0, h_out, row_chunk):          # static unroll (<= 8 chunks)
        r1 = min(r0 + row_chunk, h_out)
        rows = r1 - r0
        x_lo = max(r0, top)
        x_hi = min(r1, top + h)

        if x_hi <= x_lo:
            # Chunk is entirely border: plain zero store (single touch).
            o_ref[:, r0:r1, :] = jnp.zeros((ct, rows, w_out), dtype=dt)
            continue

        xr = x_hi - x_lo
        xb = x_ref[:, x_lo - top:x_hi - top, :]

        # Lane-direction padding: zeros | x | zeros along the lane axis.
        cparts = []
        if left > 0:
            cparts.append(jnp.zeros((ct, xr, left), dtype=dt))
        cparts.append(xb)
        if right > 0:
            cparts.append(jnp.zeros((ct, xr, right), dtype=dt))
        mid = cparts[0] if len(cparts) == 1 else jnp.concatenate(cparts, axis=-1)

        # Row-direction padding inside the chunk so the store start stays
        # sublane-aligned (the few shifted rows cost XLU slots, which are
        # idle in this memory-bound kernel).
        rparts = []
        if x_lo > r0:
            rparts.append(jnp.zeros((ct, x_lo - r0, w_out), dtype=dt))
        rparts.append(mid)
        if r1 > x_hi:
            rparts.append(jnp.zeros((ct, r1 - x_hi, w_out), dtype=dt))
        chunk = rparts[0] if len(rparts) == 1 else jnp.concatenate(rparts, axis=1)

        o_ref[:, r0:r1, :] = chunk


# Target for (double-buffered input + output blocks) + chunk temporary.
# 20 MiB + 8 MiB slack stays well under the 32 MiB scoped default and the
# 64 MiB physical VMEM of v7x, with room for Mosaic internal scratch.
_VMEM_BUDGET = 20 << 20


def _block_footprint(ct, h_in, w_in, h_out, w_out, itemsize, sub, row_chunk):
    """VMEM bytes for one grid step: 2x (in + out) blocks + chunk temp."""
    in_blk = ct * _round_up(h_in, sub) * _round_up(w_in, 128) * itemsize
    out_blk = ct * _round_up(h_out, sub) * _round_up(w_out, 128) * itemsize
    tmp = ct * _round_up(row_chunk, sub) * _round_up(w_out, 128) * itemsize
    return 2 * (in_blk + out_blk) + tmp


def _pick_channel_tile(nc, h_in, w_in, h_out, w_out, itemsize, sub, row_chunk):
    """Largest divisor of nc whose footprint fits the VMEM budget."""
    divisors = [t for t in range(1, nc + 1) if nc % t == 0]
    fitting = [t for t in divisors
               if _block_footprint(t, h_in, w_in, h_out, w_out,
                                   itemsize, sub, row_chunk) <= _VMEM_BUDGET]
    best = max(fitting) if fitting else 1

    # Prefer >= 2 grid steps (v7x has 2 TCs sharing the write path) only when
    # each step's output block stays >= ~2 MiB; below that, single-TC chips
    # (v5e/v6e) would just pay extra per-step overhead for no gain.
    if nc // best < 2:
        multi = [t for t in fitting if nc // t >= 2]
        if multi:
            cand = max(multi)
            out_blk = cand * _round_up(h_out, sub) * _round_up(w_out, 128) * itemsize
            if out_blk >= (2 << 20):
                best = cand
    return best


def pad_to(x, dim=256):
    """JAX/Pallas equivalent of PadTo.forward (fill value 0)."""
    n, c, h0, w0 = x.shape

    # odd width  -> pre-pad 1 column on the left  (F.pad(img, [1,0,0,0]))
    # odd height -> pre-pad 1 row on the top      (F.pad(img, [0,1,0,0]))
    pre_left = 1 if (w0 % 2 != 0) else 0
    pre_top = 1 if (h0 % 2 != 0) else 0
    w = w0 + pre_left
    h = h0 + pre_top

    if w > h:
        px, py = 0, int((dim - h) / 2)
    elif w < h:
        px, py = int((dim - w) / 2), 0
    else:
        px = int((dim - w) / 2)
        py = px

    if px < 0 or py < 0:
        raise ValueError(
            f"PadTo: input ({h0}x{w0}) larger than target dim={dim}; "
            "negative padding is not supported.")

    h_out = h + 2 * py
    w_out = w + 2 * px
    top = py + pre_top    # row offset of the original image inside the output
    left = px + pre_left  # col offset of the original image inside the output

    itemsize = x.dtype.itemsize
    sub = {1: 32, 2: 16}.get(itemsize, 8)   # sublane tile rows per dtype
    row_chunk = max(sub, 32)                # aligned chunk height for stores

    nc = n * c
    x_flat = x.reshape(nc, h0, w0)
    c_tile = _pick_channel_tile(nc, h0, w0, h_out, w_out, itemsize, sub, row_chunk)
    grid = (nc // c_tile,)

    vmem_need = _block_footprint(c_tile, h0, w0, h_out, w_out,
                                 itemsize, sub, row_chunk)
    vmem_limit = int(vmem_need + (8 << 20))   # honest need + compiler-scratch slack

    kernel = functools.partial(_pad_to_kernel, top=top, left=left,
                               row_chunk=row_chunk)

    # TODO(synk): when nc is tiny/odd, additionally split h_out across a
    # second 'parallel' grid axis so both v7x TensorCores share the writeback.
    out_flat = pl.pallas_call(
        kernel,
        out_shape=jax.ShapeDtypeStruct((nc, h_out, w_out), x.dtype),
        grid_spec=pltpu.PrefetchScalarGridSpec(
            num_scalar_prefetch=0,
            grid=grid,
            in_specs=[
                pl.BlockSpec((c_tile, h0, w0), lambda i: (i, 0, 0)),
            ],
            out_specs=pl.BlockSpec((c_tile, h_out, w_out),
                                   lambda i: (i, 0, 0)),
        ),
        compiler_params=pltpu.CompilerParams(
            dimension_semantics=("parallel",),
            vmem_limit_bytes=vmem_limit),
        cost_estimate=pl.CostEstimate(
            flops=0, transcendentals=0,
            bytes_accessed=nc * (h_out * w_out + h0 * w0) * itemsize),
    )(x_flat)

    return out_flat.reshape(n, c, h_out, w_out)


def _ref_pad(x, dim=256):
    """Pure-JAX reference with identical offset math."""
    n, c, h0, w0 = x.shape
    pre_left = 1 if (w0 % 2 != 0) else 0
    pre_top = 1 if (h0 % 2 != 0) else 0
    w, h = w0 + pre_left, h0 + pre_top
    if w > h:
        px, py = 0, int((dim - h) / 2)
    elif w < h:
        px, py = int((dim - w) / 2), 0
    else:
        px = int((dim - w) / 2)
        py = px
    return jnp.pad(x, ((0, 0), (0, 0),
                       (py + pre_top, py), (px + pre_left, px)))


if __name__ == "__main__":
    key = jax.random.PRNGKey(0)
    cases = [
        (2, 4, 15, 16),   # odd H -> pre-pad; then W == H (square) branch
        (1, 3, 16, 32),   # W > H branch (only H padded to dim)
        (1, 2, 33, 16),   # odd H -> pre-pad; W < H branch (only W padded to dim)
    ]
    for i, shape in enumerate(cases):
        x = jax.random.normal(jax.random.fold_in(key, i), shape,
                              dtype=jnp.float32)
        out = jax.block_until_ready(pad_to(x, dim=256))
        ref = _ref_pad(x, dim=256)
        assert out.shape == ref.shape, (shape, out.shape, ref.shape)
        assert out.dtype == x.dtype
        assert bool(jnp.allclose(out, ref)), f"mismatch vs reference for {shape}"

    print("KERNEL_OK")
</pallas_src>

<mosaic_0001>
module attributes {stable_mosaic.version = 11 : i64} {
  func.func @_pad_to_kernel(%arg0: i32, %arg1: memref<8x15x16xf32, #tpu.memory_space<vmem>>, %arg2: memref<8x256x256xf32, #tpu.memory_space<vmem>>) attributes {dimension_semantics = [#tpu.dimension_semantics<parallel>], iteration_bounds = array<i64: 1>, scalar_prefetch = 0 : i64, scratch_operands = 0 : i64, tpu.core_type = #tpu.core_type<tc>, window_params = [{transform_indices = @transform_0, window_bounds = array<i64: 8, 15, 16>}, {transform_indices = @transform_1, window_bounds = array<i64: 8, 256, 256>}]} {
    %cst = arith.constant 0.000000e+00 : f32
    %0 = vector.broadcast %cst : f32 to vector<8x32x256xf32>
    %c0 = arith.constant 0 : index
    %c0_0 = arith.constant 0 : index
    %c0_1 = arith.constant 0 : index
    %1 = vector.load %arg2[%c0, %c0_0, %c0_1] : memref<8x256x256xf32, #tpu.memory_space<vmem>>, vector<8x32x256xf32>
    tpu.vector_store %arg2[%c0, %c0_0, %c0_1], %0 {strides = array<i32>} : memref<8x256x256xf32, #tpu.memory_space<vmem>>, vector<8x32x256xf32>,
    %cst_2 = arith.constant 0.000000e+00 : f32
    %2 = vector.broadcast %cst_2 : f32 to vector<8x32x256xf32>
    %c0_3 = arith.constant 0 : index
    %c32 = arith.constant 32 : index
    %c0_4 = arith.constant 0 : index
    %3 = vector.load %arg2[%c0_3, %c32, %c0_4] : memref<8x256x256xf32, #tpu.memory_space<vmem>>, vector<8x32x256xf32>
    tpu.vector_store %arg2[%c0_3, %c32, %c0_4], %2 {strides = array<i32>} : memref<8x256x256xf32, #tpu.memory_space<vmem>>, vector<8x32x256xf32>,
    %cst_5 = arith.constant 0.000000e+00 : f32
    %4 = vector.broadcast %cst_5 : f32 to vector<8x32x256xf32>
    %c0_6 = arith.constant 0 : index
    %c64 = arith.constant 64 : index
    %c0_7 = arith.constant 0 : index
    %5 = vector.load %arg2[%c0_6, %c64, %c0_7] : memref<8x256x256xf32, #tpu.memory_space<vmem>>, vector<8x32x256xf32>
    tpu.vector_store %arg2[%c0_6, %c64, %c0_7], %4 {strides = array<i32>} : memref<8x256x256xf32, #tpu.memory_space<vmem>>, vector<8x32x256xf32>,
    %c0_8 = arith.constant 0 : index
    %c0_9 = arith.constant 0 : index
    %c0_10 = arith.constant 0 : index
    %6 = vector.load %arg1[%c0_8, %c0_9, %c0_10] : memref<8x15x16xf32, #tpu.memory_space<vmem>>, vector<8x7x16xf32>
    %cst_11 = arith.constant 0.000000e+00 : f32
    %7 = vector.broadcast %cst_11 : f32 to vector<8x7x120xf32>
    %cst_12 = arith.constant 0.000000e+00 : f32
    %8 = vector.broadcast %cst_12 : f32 to vector<8x7x120xf32>
    %9 = tpu.concatenate %7, %6, %8 in 2 : vector<8x7x120xf32>, vector<8x7x16xf32>, vector<8x7x120xf32> -> vector<8x7x256xf32>
    %cst_13 = arith.constant 0.000000e+00 : f32
    %10 = vector.broadcast %cst_13 : f32 to vector<8x25x256xf32>
    %11 = tpu.concatenate %10, %9 in 1 : vector<8x25x256xf32>, vector<8x7x256xf32> -> vector<8x32x256xf32>
    %c0_14 = arith.constant 0 : index
    %c96 = arith.constant 96 : index
    %c0_15 = arith.constant 0 : index
    %12 = vector.load %arg2[%c0_14, %c96, %c0_15] : memref<8x256x256xf32, #tpu.memory_space<vmem>>, vector<8x32x256xf32>
    tpu.vector_store %arg2[%c0_14, %c96, %c0_15], %11 {strides = array<i32>} : memref<8x256x256xf32, #tpu.memory_space<vmem>>, vector<8x32x256xf32>,
    %c0_16 = arith.constant 0 : index
    %c7 = arith.constant 7 : index
    %c0_17 = arith.constant 0 : index
    %13 = vector.load %arg1[%c0_16, %c7, %c0_17] : memref<8x15x16xf32, #tpu.memory_space<vmem>>, vector<8x8x16xf32>
    %cst_18 = arith.constant 0.000000e+00 : f32
    %14 = vector.broadcast %cst_18 : f32 to vector<8x8x120xf32>
    %cst_19 = arith.constant 0.000000e+00 : f32
    %15 = vector.broadcast %cst_19 : f32 to vector<8x8x120xf32>
    %16 = tpu.concatenate %14, %13, %15 in 2 : vector<8x8x120xf32>, vector<8x8x16xf32>, vector<8x8x120xf32> -> vector<8x8x256xf32>
    %cst_20 = arith.constant 0.000000e+00 : f32
    %17 = vector.broadcast %cst_20 : f32 to vector<8x24x256xf32>
    %18 = tpu.concatenate %16, %17 in 1 : vector<8x8x256xf32>, vector<8x24x256xf32> -> vector<8x32x256xf32>
    %c0_21 = arith.constant 0 : index
    %c128 = arith.constant 128 : index
    %c0_22 = arith.constant 0 : index
    %19 = vector.load %arg2[%c0_21, %c128, %c0_22] : memref<8x256x256xf32, #tpu.memory_space<vmem>>, vector<8x32x256xf32>
    tpu.vector_store %arg2[%c0_21, %c128, %c0_22], %18 {strides = array<i32>} : memref<8x256x256xf32, #tpu.memory_space<vmem>>, vector<8x32x256xf32>,
    %cst_23 = arith.constant 0.000000e+00 : f32
    %20 = vector.broadcast %cst_23 : f32 to vector<8x32x256xf32>
    %c0_24 = arith.constant 0 : index
    %c160 = arith.constant 160 : index
    %c0_25 = arith.constant 0 : index
    %21 = vector.load %arg2[%c0_24, %c160, %c0_25] : memref<8x256x256xf32, #tpu.memory_space<vmem>>, vector<8x32x256xf32>
    tpu.vector_store %arg2[%c0_24, %c160, %c0_25], %20 {strides = array<i32>} : memref<8x256x256xf32, #tpu.memory_space<vmem>>, vector<8x32x256xf32>,
    %cst_26 = arith.constant 0.000000e+00 : f32
    %22 = vector.broadcast %cst_26 : f32 to vector<8x32x256xf32>
    %c0_27 = arith.constant 0 : index
    %c192 = arith.constant 192 : index
    %c0_28 = arith.constant 0 : index
    %23 = vector.load %arg2[%c0_27, %c192, %c0_28] : memref<8x256x256xf32, #tpu.memory_space<vmem>>, vector<8x32x256xf32>
    tpu.vector_store %arg2[%c0_27, %c192, %c0_28], %22 {strides = array<i32>} : memref<8x256x256xf32, #tpu.memory_space<vmem>>, vector<8x32x256xf32>,
    %cst_29 = arith.constant 0.000000e+00 : f32
    %24 = vector.broadcast %cst_29 : f32 to vector<8x32x256xf32>
    %c0_30 = arith.constant 0 : index
    %c224 = arith.constant 224 : index
    %c0_31 = arith.constant 0 : index
    %25 = vector.load %arg2[%c0_30, %c224, %c0_31] : memref<8x256x256xf32, #tpu.memory_space<vmem>>, vector<8x32x256xf32>
    tpu.vector_store %arg2[%c0_30, %c224, %c0_31], %24 {strides = array<i32>} : memref<8x256x256xf32, #tpu.memory_space<vmem>>, vector<8x32x256xf32>,
    return
  }
  func.func @transform_0(%arg0: i32) -> (i32, i32, i32) {
    %c0_i32 = arith.constant 0 : i32
    %c0_i32_0 = arith.constant 0 : i32
    %c0_i32_1 = arith.constant 0 : i32
    return %arg0, %c0_i32, %c0_i32_0 : i32, i32, i32
  }
  func.func @transform_1(%arg0: i32) -> (i32, i32, i32) {
    %c0_i32 = arith.constant 0 : i32
    %c0_i32_0 = arith.constant 0 : i32
    %c0_i32_1 = arith.constant 0 : i32
    return %arg0, %c0_i32, %c0_i32_0 : i32, i32, i32
  }
}

</mosaic_0001>

<bundles_post_ra>
// kernel: tpu_custom_call.1
= control target key start
LH: loop header
LB: loop body
LE: loop exit
PB: predicated region body
PF: predicated region fallthrough
CT: control target
= control target key end

     0   :  { %s743_s10 = smov 120   ;;  %s1353_s0 = inlined_call_operand.vmem [shape: f32[8,15,16], index: 0, kind: input, shape index: {}]   ;;  %s1354_s1 = inlined_call_operand.hbm [shape: f32[8,256,256], index: 1, kind: output, shape index: {}]  }
   0x1   :  { %v203_v0 = vld [vmem:[%s1353_s0 + $0x20] sm:$0x7f]  ;;  %v204_v2 = vld [vmem:[%s1353_s0 + $0x30] sm:$0x7f] }
   0x2   :  { %v201_v1 = vld [vmem:[%s1353_s0] sm:$0x7f]  ;;  %221 = vrot.lane.b32.xlu1 %v203_v0, %s743_s10  ;;  %v202_v3 = vld [vmem:[%s1353_s0 + $0x10] sm:$0x7f] }
   0x3   :  { %217 = vrot.lane.b32.xlu0 %v201_v1, %s743_s10  ;;  %v206_v4 = vld [vmem:[%s1353_s0 + $0x50] sm:$0x7f]  ;;  %v205_v5 = vld [vmem:[%s1353_s0 + $0x40] sm:$0x7f] }
   0x6   :  { %223 = vrot.lane.b32.xlu1 %v204_v2, %s743_s10 }
   0x7   :  { %219 = vrot.lane.b32.xlu0 %v202_v3, %s743_s10 }
   0x8   :  { %6 = vsyncpa [#allocation3], 0  ;;  %v208_v6 = vld [vmem:[%s1353_s0 + $0x70] sm:$0x7f]  ;;  %v207_v7 = vld [vmem:[%s1353_s0 + $0x60] sm:$0x7f] }
   0x9   :  { %v389_v8 = vld [vmem:[%s1353_s0 + $0x17] sm:$0xff]  ;;  %v388_v9 = vld [vmem:[%s1353_s0 + $0x7] sm:$0xff]  ;;  %v744_v10 = vmov 0.0   ;;  %vm241_vm0 = vcmask 982016   ;;  %vm250_vm1 = vcmask 64512   ;;  %vm307_vm2 = vcmask 1040384  }
   0xa   :  { %227 = vrot.lane.b32.xlu1 %v206_v4, %s743_s10  ;;  %9 = vst [vmem:[#allocation2] sm:$0xff] %v744_v10  ;;  %10 = vst [vmem:[#allocation2 + $0x8] sm:$0xff] %v744_v10  ;;  %v391_v11 = vld [vmem:[%s1353_s0 + $0x37] sm:$0xff]  ;;  %v390_v12 = vld [vmem:[%s1353_s0 + $0x27] sm:$0xff] }
   0xb   :  { %225 = vrot.lane.b32.xlu0 %v205_v5, %s743_s10  ;;  %11 = vst [vmem:[#allocation2 + $0x10] sm:$0xff] %v744_v10  ;;  %12 = vst [vmem:[#allocation2 + $0x18] sm:$0xff] %v744_v10  ;;  %v393_v13 = vld [vmem:[%s1353_s0 + $0x57] sm:$0xff]  ;;  %v392_v14 = vld [vmem:[%s1353_s0 + $0x47] sm:$0xff] }
   0xc   :  { %13 = vst [vmem:[#allocation2 + $0x20] sm:$0xff] %v744_v10  ;;  %14 = vst [vmem:[#allocation2 + $0x28] sm:$0xff] %v744_v10  ;;  %v395_v15 = vld [vmem:[%s1353_s0 + $0x77] sm:$0xff]  ;;  %v394_v16 = vld [vmem:[%s1353_s0 + $0x67] sm:$0xff]  ;;  %s745_s0 = smov [#allocation2]  }
   0xd   :  { %15 = vst [vmem:[#allocation2 + $0x30] sm:$0xff] %v744_v10  ;;  %16 = vst [vmem:[#allocation2 + $0x38] sm:$0xff] %v744_v10 }
   0xe   :  { %231 = vrot.lane.b32.xlu1 %v208_v6, %s743_s10  ;;  %17 = vst [vmem:[#allocation2 + $0x200] sm:$0xff] %v744_v10  ;;  %18 = vst [vmem:[#allocation2 + $0x208] sm:$0xff] %v744_v10 }
   0xf   :  { %229 = vrot.lane.b32.xlu0 %v207_v7, %s743_s10  ;;  %19 = vst [vmem:[#allocation2 + $0x210] sm:$0xff] %v744_v10  ;;  %20 = vst [vmem:[#allocation2 + $0x218] sm:$0xff] %v744_v10 }
  0x10   :  { %21 = vst [vmem:[#allocation2 + $0x220] sm:$0xff] %v744_v10  ;;  %22 = vst [vmem:[#allocation2 + $0x228] sm:$0xff] %v744_v10 }
  0x11   :  { %23 = vst [vmem:[#allocation2 + $0x230] sm:$0xff] %v744_v10  ;;  %24 = vst [vmem:[#allocation2 + $0x238] sm:$0xff] %v744_v10 }
  0x12   :  { %406 = vrot.lane.b32.xlu1 %v389_v8, %s743_s10  ;;  %25 = vst [vmem:[#allocation2 + $0x400] sm:$0xff] %v744_v10  ;;  %26 = vst [vmem:[#allocation2 + $0x408] sm:$0xff] %v744_v10 }
  0x13   :  { %404 = vrot.lane.b32.xlu0 %v388_v9, %s743_s10  ;;  %27 = vst [vmem:[#allocation2 + $0x410] sm:$0xff] %v744_v10  ;;  %28 = vst [vmem:[#allocation2 + $0x418] sm:$0xff] %v744_v10 }
  0x14   :  { %29 = vst [vmem:[#allocation2 + $0x420] sm:$0xff] %v744_v10  ;;  %30 = vst [vmem:[#allocation2 + $0x428] sm:$0xff] %v744_v10 }
  0x15   :  { %31 = vst [vmem:[#allocation2 + $0x430] sm:$0xff] %v744_v10  ;;  %32 = vst [vmem:[#allocation2 + $0x438] sm:$0xff] %v744_v10 }
  0x16   :  { %33 = vst [vmem:[#allocation2 + $0x600] sm:$0xff] %v744_v10  ;;  %34 = vst [vmem:[#allocation2 + $0x608] sm:$0xff] %v744_v10  ;;  %410 = vrot.lane.b32.xlu1 %v391_v11, %s743_s10 }
  0x17   :  { %35 = vst [vmem:[#allocation2 + $0x610] sm:$0xff] %v744_v10  ;;  %36 = vst [vmem:[#allocation2 + $0x618] sm:$0xff] %v744_v10  ;;  %408 = vrot.lane.b32.xlu0 %v390_v12, %s743_s10 }
  0x18   :  { %37 = vst [vmem:[#allocation2 + $0x620] sm:$0xff] %v744_v10  ;;  %38 = vst [vmem:[#allocation2 + $0x628] sm:$0xff] %v744_v10 }
  0x19   :  { %39 = vst [vmem:[#allocation2 + $0x630] sm:$0xff] %v744_v10  ;;  %40 = vst [vmem:[#allocation2 + $0x638] sm:$0xff] %v744_v10 }
  0x1a   :  { %41 = vst [vmem:[#allocation2 + $0x800] sm:$0xff] %v744_v10  ;;  %42 = vst [vmem:[#allocation2 + $0x808] sm:$0xff] %v744_v10  ;;  %414 = vrot.lane.b32.xlu1 %v393_v13, %s743_s10 }
  0x1b   :  { %43 = vst [vmem:[#allocation2 + $0x810] sm:$0xff] %v744_v10  ;;  %44 = vst [vmem:[#allocation2 + $0x818] sm:$0xff] %v744_v10  ;;  %412 = vrot.lane.b32.xlu0 %v392_v14, %s743_s10 }
  0x1c   :  { %45 = vst [vmem:[#allocation2 + $0x820] sm:$0xff] %v744_v10  ;;  %46 = vst [vmem:[#allocation2 + $0x828] sm:$0xff] %v744_v10 }
  0x1d   :  { %47 = vst [vmem:[#allocation2 + $0x830] sm:$0xff] %v744_v10  ;;  %48 = vst [vmem:[#allocation2 + $0x838] sm:$0xff] %v744_v10 }
  0x1e   :  { %49 = vst [vmem:[#allocation2 + $0xa00] sm:$0xff] %v744_v10  ;;  %50 = vst [vmem:[#allocation2 + $0xa08] sm:$0xff] %v744_v10  ;;  %418 = vrot.lane.b32.xlu1 %v395_v15, %s743_s10 }
  0x1f   :  { %51 = vst [vmem:[#allocation2 + $0xa10] sm:$0xff] %v744_v10  ;;  %52 = vst [vmem:[#allocation2 + $0xa18] sm:$0xff] %v744_v10  ;;  %416 = vrot.lane.b32.xlu0 %v394_v16, %s743_s10  ;;  %s705_s10 = sshll.u32 %s745_s0, 4  ;;  %s706_s10 = int_to_ptr.vmem [resolvable:$true] %s705_s10 }
  0x20   :  { %53 = vst [vmem:[#allocation2 + $0xa20] sm:$0xff] %v744_v10  ;;  %54 = vst [vmem:[#allocation2 + $0xa28] sm:$0xff] %v744_v10  ;;  %s721_s11 = scalar_lea.vmem %s706_s10, 65536  ;;  %p726_p1 = scmp.lt.s32.totalorder %s706_s10, %s706_s10 }
  0x21   :  { %55 = vst [vmem:[#allocation2 + $0xa30] sm:$0xff] %v744_v10  ;;  %56 = vst [vmem:[#allocation2 + $0xa38] sm:$0xff] %v744_v10  ;;  %p722_p0 = scmp.ne.s32.totalorder %s706_s10, %s721_s11  ;;  %p727_p2 = scmp.lt.s32.totalorder %s721_s11, %s721_s11 }
  0x22   :  { %57 = vst [vmem:[#allocation2 + $0xc00] sm:$0xff] %v744_v10  ;;  %58 = vst [vmem:[#allocation2 + $0xc08] sm:$0xff] %v744_v10 }
  0x23   :  { %59 = vst [vmem:[#allocation2 + $0xc10] sm:$0xff] %v744_v10  ;;  %60 = vst [vmem:[#allocation2 + $0xc18] sm:$0xff] %v744_v10  ;;  %p728_p3 = por %p727_p2, %p726_p1 }
  0x24   :  { %61 = vst [vmem:[#allocation2 + $0xc20] sm:$0xff] %v744_v10  ;;  %62 = vst [vmem:[#allocation2 + $0xc28] sm:$0xff] %v744_v10 }
  0x25   :  { %63 = vst [vmem:[#allocation2 + $0xc30] sm:$0xff] %v744_v10  ;;  %64 = vst [vmem:[#allocation2 + $0xc38] sm:$0xff] %v744_v10  ;;  %p729_p4 = pnand %p728_p3, %p722_p0 }
  0x26   :  { %65 = vst [vmem:[#allocation2 + $0xe00] sm:$0xff] %v744_v10  ;;  %66 = vst [vmem:[#allocation2 + $0xe08] sm:$0xff] %v744_v10 }
  0x27   :  { %67 = vst [vmem:[#allocation2 + $0xe10] sm:$0xff] %v744_v10  ;;  %68 = vst [vmem:[#allocation2 + $0xe18] sm:$0xff] %v744_v10 }
  0x28   :  { %69 = vst [vmem:[#allocation2 + $0xe20] sm:$0xff] %v744_v10  ;;  %70 = vst [vmem:[#allocation2 + $0xe28] sm:$0xff] %v744_v10 }
  0x29   :  { %71 = vst [vmem:[#allocation2 + $0xe30] sm:$0xff] %v744_v10  ;;  %72 = vst [vmem:[#allocation2 + $0xe38] sm:$0xff] %v744_v10 }
  0x2a   :  { %73 = vst [vmem:[#allocation2 + $0x40] sm:$0xff] %v744_v10  ;;  %74 = vst [vmem:[#allocation2 + $0x48] sm:$0xff] %v744_v10 }
  0x2b   :  { %75 = vst [vmem:[#allocation2 + $0x50] sm:$0xff] %v744_v10  ;;  %76 = vst [vmem:[#allocation2 + $0x58] sm:$0xff] %v744_v10 }
  0x2c   :  { %77 = vst [vmem:[#allocation2 + $0x60] sm:$0xff] %v744_v10  ;;  %78 = vst [vmem:[#allocation2 + $0x68] sm:$0xff] %v744_v10 }
  0x2d   :  { %79 = vst [vmem:[#allocation2 + $0x70] sm:$0xff] %v744_v10  ;;  %80 = vst [vmem:[#allocation2 + $0x78] sm:$0xff] %v744_v10 }
  0x2e   :  { %81 = vst [vmem:[#allocation2 + $0x240] sm:$0xff] %v744_v10  ;;  %82 = vst [vmem:[#allocation2 + $0x248] sm:$0xff] %v744_v10 }
  0x2f   :  { %83 = vst [vmem:[#allocation2 + $0x250] sm:$0xff] %v744_v10  ;;  %84 = vst [vmem:[#allocation2 + $0x258] sm:$0xff] %v744_v10 }
  0x30   :  { %85 = vst [vmem:[#allocation2 + $0x260] sm:$0xff] %v744_v10  ;;  %86 = vst [vmem:[#allocation2 + $0x268] sm:$0xff] %v744_v10 }
  0x31   :  { %87 = vst [vmem:[#allocation2 + $0x270] sm:$0xff] %v744_v10  ;;  %88 = vst [vmem:[#allocation2 + $0x278] sm:$0xff] %v744_v10 }
  0x32   :  { %89 = vst [vmem:[#allocation2 + $0x440] sm:$0xff] %v744_v10  ;;  %90 = vst [vmem:[#allocation2 + $0x448] sm:$0xff] %v744_v10 }
  0x33   :  { %91 = vst [vmem:[#allocation2 + $0x450] sm:$0xff] %v744_v10  ;;  %92 = vst [vmem:[#allocation2 + $0x458] sm:$0xff] %v744_v10 }
  0x34   :  { %93 = vst [vmem:[#allocation2 + $0x460] sm:$0xff] %v744_v10  ;;  %94 = vst [vmem:[#allocation2 + $0x468] sm:$0xff] %v744_v10 }
  0x35   :  { %95 = vst [vmem:[#allocation2 + $0x470] sm:$0xff] %v744_v10  ;;  %96 = vst [vmem:[#allocation2 + $0x478] sm:$0xff] %v744_v10 }
  0x36   :  { %97 = vst [vmem:[#allocation2 + $0x640] sm:$0xff] %v744_v10  ;;  %98 = vst [vmem:[#allocation2 + $0x648] sm:$0xff] %v744_v10 }
  0x37   :  { %99 = vst [vmem:[#allocation2 + $0x650] sm:$0xff] %v744_v10  ;;  %100 = vst [vmem:[#allocation2 + $0x658] sm:$0xff] %v744_v10 }
  0x38   :  { %101 = vst [vmem:[#allocation2 + $0x660] sm:$0xff] %v744_v10  ;;  %102 = vst [vmem:[#allocation2 + $0x668] sm:$0xff] %v744_v10 }
  0x39   :  { %103 = vst [vmem:[#allocation2 + $0x670] sm:$0xff] %v744_v10  ;;  %104 = vst [vmem:[#allocation2 + $0x678] sm:$0xff] %v744_v10 }
  0x3a   :  { %105 = vst [vmem:[#allocation2 + $0x840] sm:$0xff] %v744_v10  ;;  %106 = vst [vmem:[#allocation2 + $0x848] sm:$0xff] %v744_v10 }
  0x3b   :  { %107 = vst [vmem:[#allocation2 + $0x850] sm:$0xff] %v744_v10  ;;  %108 = vst [vmem:[#allocation2 + $0x858] sm:$0xff] %v744_v10 }
  0x3c   :  { %109 = vst [vmem:[#allocation2 + $0x860] sm:$0xff] %v744_v10  ;;  %110 = vst [vmem:[#allocation2 + $0x868] sm:$0xff] %v744_v10 }
  0x3d   :  { %111 = vst [vmem:[#allocation2 + $0x870] sm:$0xff] %v744_v10  ;;  %112 = vst [vmem:[#allocation2 + $0x878] sm:$0xff] %v744_v10 }
  0x3e   :  { %113 = vst [vmem:[#allocation2 + $0xa40] sm:$0xff] %v744_v10  ;;  %114 = vst [vmem:[#allocation2 + $0xa48] sm:$0xff] %v744_v10 }
  0x3f   :  { %115 = vst [vmem:[#allocation2 + $0xa50] sm:$0xff] %v744_v10  ;;  %116 = vst [vmem:[#allocation2 + $0xa58] sm:$0xff] %v744_v10 }
  0x40   :  { %117 = vst [vmem:[#allocation2 + $0xa60] sm:$0xff] %v744_v10  ;;  %118 = vst [vmem:[#allocation2 + $0xa68] sm:$0xff] %v744_v10 }
  0x41   :  { %119 = vst [vmem:[#allocation2 + $0xa70] sm:$0xff] %v744_v10  ;;  %120 = vst [vmem:[#allocation2 + $0xa78] sm:$0xff] %v744_v10 }
  0x42   :  { %121 = vst [vmem:[#allocation2 + $0xc40] sm:$0xff] %v744_v10  ;;  %122 = vst [vmem:[#allocation2 + $0xc48] sm:$0xff] %v744_v10 }
  0x43   :  { %123 = vst [vmem:[#allocation2 + $0xc50] sm:$0xff] %v744_v10  ;;  %124 = vst [vmem:[#allocation2 + $0xc58] sm:$0xff] %v744_v10 }
  0x44   :  { %125 = vst [vmem:[#allocation2 + $0xc60] sm:$0xff] %v744_v10  ;;  %126 = vst [vmem:[#allocation2 + $0xc68] sm:$0xff] %v744_v10 }
  0x45   :  { %127 = vst [vmem:[#allocation2 + $0xc70] sm:$0xff] %v744_v10  ;;  %128 = vst [vmem:[#allocation2 + $0xc78] sm:$0xff] %v744_v10 }
  0x46   :  { %129 = vst [vmem:[#allocation2 + $0xe40] sm:$0xff] %v744_v10  ;;  %130 = vst [vmem:[#allocation2 + $0xe48] sm:$0xff] %v744_v10 }
  0x47   :  { %131 = vst [vmem:[#allocation2 + $0xe50] sm:$0xff] %v744_v10  ;;  %132 = vst [vmem:[#allocation2 + $0xe58] sm:$0xff] %v744_v10 }
  0x48   :  { %133 = vst [vmem:[#allocation2 + $0xe60] sm:$0xff] %v744_v10  ;;  %134 = vst [vmem:[#allocation2 + $0xe68] sm:$0xff] %v744_v10 }
  0x49   :  { %135 = vst [vmem:[#allocation2 + $0xe70] sm:$0xff] %v744_v10  ;;  %136 = vst [vmem:[#allocation2 + $0xe78] sm:$0xff] %v744_v10 }
  0x4a   :  { %137 = vst [vmem:[#allocation2 + $0x80] sm:$0xff] %v744_v10  ;;  %138 = vst [vmem:[#allocation2 + $0x88] sm:$0xff] %v744_v10 }
  0x4b   :  { %139 = vst [vmem:[#allocation2 + $0x90] sm:$0xff] %v744_v10  ;;  %140 = vst [vmem:[#allocation2 + $0x98] sm:$0xff] %v744_v10 }
  0x4c   :  { %141 = vst [vmem:[#allocation2 + $0xa0] sm:$0xff] %v744_v10  ;;  %142 = vst [vmem:[#allocation2 + $0xa8] sm:$0xff] %v744_v10 }
  0x4d   :  { %143 = vst [vmem:[#allocation2 + $0xb0] sm:$0xff] %v744_v10  ;;  %144 = vst [vmem:[#allocation2 + $0xb8] sm:$0xff] %v744_v10 }
  0x4e   :  { %145 = vst [vmem:[#allocation2 + $0x280] sm:$0xff] %v744_v10  ;;  %146 = vst [vmem:[#allocation2 + $0x288] sm:$0xff] %v744_v10 }
  0x4f   :  { %147 = vst [vmem:[#allocation2 + $0x290] sm:$0xff] %v744_v10  ;;  %148 = vst [vmem:[#allocation2 + $0x298] sm:$0xff] %v744_v10 }
  0x50   :  { %149 = vst [vmem:[#allocation2 + $0x2a0] sm:$0xff] %v744_v10  ;;  %150 = vst [vmem:[#allocation2 + $0x2a8] sm:$0xff] %v744_v10 }
  0x51   :  { %151 = vst [vmem:[#allocation2 + $0x2b0] sm:$0xff] %v744_v10  ;;  %152 = vst [vmem:[#allocation2 + $0x2b8] sm:$0xff] %v744_v10 }
  0x52   :  { %153 = vst [vmem:[#allocation2 + $0x480] sm:$0xff] %v744_v10  ;;  %154 = vst [vmem:[#allocation2 + $0x488] sm:$0xff] %v744_v10 }
  0x53   :  { %155 = vst [vmem:[#allocation2 + $0x490] sm:$0xff] %v744_v10  ;;  %156 = vst [vmem:[#allocation2 + $0x498] sm:$0xff] %v744_v10 }
  0x54   :  { %157 = vst [vmem:[#allocation2 + $0x4a0] sm:$0xff] %v744_v10  ;;  %158 = vst [vmem:[#allocation2 + $0x4a8] sm:$0xff] %v744_v10 }
  0x55   :  { %159 = vst [vmem:[#allocation2 + $0x4b0] sm:$0xff] %v744_v10  ;;  %160 = vst [vmem:[#allocation2 + $0x4b8] sm:$0xff] %v744_v10 }
  0x56   :  { %161 = vst [vmem:[#allocation2 + $0x680] sm:$0xff] %v744_v10  ;;  %162 = vst [vmem:[#allocation2 + $0x688] sm:$0xff] %v744_v10 }
  0x57   :  { %163 = vst [vmem:[#allocation2 + $0x690] sm:$0xff] %v744_v10  ;;  %164 = vst [vmem:[#allocation2 + $0x698] sm:$0xff] %v744_v10 }
  0x58   :  { %165 = vst [vmem:[#allocation2 + $0x6a0] sm:$0xff] %v744_v10  ;;  %166 = vst [vmem:[#allocation2 + $0x6a8] sm:$0xff] %v744_v10 }
  0x59   :  { %167 = vst [vmem:[#allocation2 + $0x6b0] sm:$0xff] %v744_v10  ;;  %168 = vst [vmem:[#allocation2 + $0x6b8] sm:$0xff] %v744_v10 }
  0x5a   :  { %169 = vst [vmem:[#allocation2 + $0x880] sm:$0xff] %v744_v10  ;;  %170 = vst [vmem:[#allocation2 + $0x888] sm:$0xff] %v744_v10 }
  0x5b   :  { %171 = vst [vmem:[#allocation2 + $0x890] sm:$0xff] %v744_v10  ;;  %172 = vst [vmem:[#allocation2 + $0x898] sm:$0xff] %v744_v10 }
  0x5c   :  { %173 = vst [vmem:[#allocation2 + $0x8a0] sm:$0xff] %v744_v10  ;;  %174 = vst [vmem:[#allocation2 + $0x8a8] sm:$0xff] %v744_v10 }
  0x5d   :  { %175 = vst [vmem:[#allocation2 + $0x8b0] sm:$0xff] %v744_v10  ;;  %176 = vst [vmem:[#allocation2 + $0x8b8] sm:$0xff] %v744_v10 }
  0x5e   :  { %177 = vst [vmem:[#allocation2 + $0xa80] sm:$0xff] %v744_v10  ;;  %178 = vst [vmem:[#allocation2 + $0xa88] sm:$0xff] %v744_v10 }
  0x5f   :  { %179 = vst [vmem:[#allocation2 + $0xa90] sm:$0xff] %v744_v10  ;;  %180 = vst [vmem:[#allocation2 + $0xa98] sm:$0xff] %v744_v10 }
  0x60   :  { %181 = vst [vmem:[#allocation2 + $0xaa0] sm:$0xff] %v744_v10  ;;  %182 = vst [vmem:[#allocation2 + $0xaa8] sm:$0xff] %v744_v10 }
  0x61   :  { %183 = vst [vmem:[#allocation2 + $0xab0] sm:$0xff] %v744_v10  ;;  %184 = vst [vmem:[#allocation2 + $0xab8] sm:$0xff] %v744_v10 }
  0x62   :  { %185 = vst [vmem:[#allocation2 + $0xc80] sm:$0xff] %v744_v10  ;;  %186 = vst [vmem:[#allocation2 + $0xc88] sm:$0xff] %v744_v10 }
  0x63   :  { %187 = vst [vmem:[#allocation2 + $0xc90] sm:$0xff] %v744_v10  ;;  %188 = vst [vmem:[#allocation2 + $0xc98] sm:$0xff] %v744_v10 }
  0x64   :  { %189 = vst [vmem:[#allocation2 + $0xca0] sm:$0xff] %v744_v10  ;;  %190 = vst [vmem:[#allocation2 + $0xca8] sm:$0xff] %v744_v10 }
  0x65   :  { %191 = vst [vmem:[#allocation2 + $0xcb0] sm:$0xff] %v744_v10  ;;  %192 = vst [vmem:[#allocation2 + $0xcb8] sm:$0xff] %v744_v10 }
  0x66   :  { %193 = vst [vmem:[#allocation2 + $0xe80] sm:$0xff] %v744_v10  ;;  %194 = vst [vmem:[#allocation2 + $0xe88] sm:$0xff] %v744_v10 }
  0x67   :  { %195 = vst [vmem:[#allocation2 + $0xe90] sm:$0xff] %v744_v10  ;;  %196 = vst [vmem:[#allocation2 + $0xe98] sm:$0xff] %v744_v10 }
  0x68   :  { %197 = vst [vmem:[#allocation2 + $0xea0] sm:$0xff] %v744_v10  ;;  %198 = vst [vmem:[#allocation2 + $0xea8] sm:$0xff] %v744_v10 }
  0x69   :  { %199 = vst [vmem:[#allocation2 + $0xeb0] sm:$0xff] %v744_v10  ;;  %200 = vst [vmem:[#allocation2 + $0xeb8] sm:$0xff] %v744_v10 }
  0x6a   :  { %324 = vst [vmem:[#allocation2 + $0xc0] sm:$0xff] %v744_v10  ;;  %325 = vst [vmem:[#allocation2 + $0xc8] sm:$0xff] %v744_v10 }
  0x6b   :  { %326 = vst [vmem:[#allocation2 + $0xd0] sm:$0xff] %v744_v10  ;;  %327 = vst [vmem:[#allocation2 + $0xd8] sm:$0xff] %v744_v10 }
  0x6c   :  { %328 = vst [vmem:[#allocation2 + $0xe0] sm:$0xff] %v744_v10  ;;  %329 = vst [vmem:[#allocation2 + $0xe8] sm:$0xff] %v744_v10 }
  0x6d   :  { %332 = vst [vmem:[#allocation2 + $0x2c0] sm:$0xff] %v744_v10  ;;  %333 = vst [vmem:[#allocation2 + $0x2c8] sm:$0xff] %v744_v10 }
  0x6e   :  { %334 = vst [vmem:[#allocation2 + $0x2d0] sm:$0xff] %v744_v10  ;;  %335 = vst [vmem:[#allocation2 + $0x2d8] sm:$0xff] %v744_v10 }
  0x6f   :  { %336 = vst [vmem:[#allocation2 + $0x2e0] sm:$0xff] %v744_v10  ;;  %337 = vst [vmem:[#allocation2 + $0x2e8] sm:$0xff] %v744_v10 }
  0x70   :  { %340 = vst [vmem:[#allocation2 + $0x4c0] sm:$0xff] %v744_v10  ;;  %341 = vst [vmem:[#allocation2 + $0x4c8] sm:$0xff] %v744_v10 }
  0x71   :  { %342 = vst [vmem:[#allocation2 + $0x4d0] sm:$0xff] %v744_v10  ;;  %343 = vst [vmem:[#allocation2 + $0x4d8] sm:$0xff] %v744_v10 }
  0x72   :  { %344 = vst [vmem:[#allocation2 + $0x4e0] sm:$0xff] %v744_v10  ;;  %345 = vst [vmem:[#allocation2 + $0x4e8] sm:$0xff] %v744_v10 }
  0x73   :  { %348 = vst [vmem:[#allocation2 + $0x6c0] sm:$0xff] %v744_v10  ;;  %349 = vst [vmem:[#allocation2 + $0x6c8] sm:$0xff] %v744_v10 }
  0x74   :  { %350 = vst [vmem:[#allocation2 + $0x6d0] sm:$0xff] %v744_v10  ;;  %351 = vst [vmem:[#allocation2 + $0x6d8] sm:$0xff] %v744_v10  ;;  %v222_v17 = vpop.permute.xlu1 %221 }
  0x75   :  { %352 = vst [vmem:[#allocation2 + $0x6e0] sm:$0xff] %v744_v10  ;;  %353 = vst [vmem:[#allocation2 + $0x6e8] sm:$0xff] %v744_v10  ;;  %v218_v18 = vpop.permute.xlu0 %217  ;;  %v244_v19 = vsel %vm241_vm0, 0.0, %v222_v17  ;;  %v253_v20 = vsel %vm250_vm1, %v222_v17, 0.0 }
  0x76   :  { %356 = vst [vmem:[#allocation2 + $0x8c0] sm:$0xff] %v744_v10  ;;  %357 = vst [vmem:[#allocation2 + $0x8c8] sm:$0xff] %v744_v10  ;;  %v242_v21 = vsel %vm241_vm0, 0.0, %v218_v18  ;;  %v251_v22 = vsel %vm250_vm1, %v218_v18, 0.0  ;;  %v279_v23 = vrot.slane %v244_v19, 7  ;;  %v280_v24 = vrot.slane %v253_v20, 7 }
  0x77   :  { %358 = vst [vmem:[#allocation2 + $0x8d0] sm:$0xff] %v744_v10  ;;  %359 = vst [vmem:[#allocation2 + $0x8d8] sm:$0xff] %v744_v10  ;;  %v275_v25 = vrot.slane %v242_v21, 7  ;;  %v276_v26 = vrot.slane %v251_v22, 7 }
  0x78   :  { %360 = vst [vmem:[#allocation2 + $0x8e0] sm:$0xff] %v744_v10  ;;  %361 = vst [vmem:[#allocation2 + $0x8e8] sm:$0xff] %v744_v10  ;;  %v312_v27 = vsel %vm307_vm2, 0.0, %v279_v23  ;;  %v313_v28 = vsel %vm307_vm2, 0.0, %v280_v24  ;;  %v224_v31 = vpop.permute.xlu1 %223 }
  0x79   :  { %364 = vst [vmem:[#allocation2 + $0xac0] sm:$0xff] %v744_v10  ;;  %365 = vst [vmem:[#allocation2 + $0xac8] sm:$0xff] %v744_v10  ;;  %v308_v29 = vsel %vm307_vm2, 0.0, %v275_v25  ;;  %v309_v30 = vsel %vm307_vm2, 0.0, %v276_v26  ;;  %v220_v32 = vpop.permute.xlu0 %219  ;;  %v245_v33 = vsel %vm241_vm0, 0.0, %v224_v31  ;;  %v254_v34 = vsel %vm250_vm1, %v224_v31, 0.0 }
  0x7a   :  { %366 = vst [vmem:[#allocation2 + $0xad0] sm:$0xff] %v744_v10  ;;  %367 = vst [vmem:[#allocation2 + $0xad8] sm:$0xff] %v744_v10  ;;  %v243_v35 = vsel %vm241_vm0, 0.0, %v220_v32  ;;  %v252_v36 = vsel %vm250_vm1, %v220_v32, 0.0  ;;  %v281_v37 = vrot.slane %v245_v33, 7  ;;  %v282_v38 = vrot.slane %v254_v34, 7 }
  0x7b   :  { %368 = vst [vmem:[#allocation2 + $0xae0] sm:$0xff] %v744_v10  ;;  %369 = vst [vmem:[#allocation2 + $0xae8] sm:$0xff] %v744_v10  ;;  %v277_v39 = vrot.slane %v243_v35, 7  ;;  %v278_v40 = vrot.slane %v252_v36, 7 }
  0x7c   :  { %372 = vst [vmem:[#allocation2 + $0xcc0] sm:$0xff] %v744_v10  ;;  %373 = vst [vmem:[#allocation2 + $0xcc8] sm:$0xff] %v744_v10  ;;  %v314_v41 = vsel %vm307_vm2, 0.0, %v281_v37  ;;  %v315_v42 = vsel %vm307_vm2, 0.0, %v282_v38  ;;  %v228_v45 = vpop.permute.xlu1 %227 }
  0x7d   :  { %374 = vst [vmem:[#allocation2 + $0xcd0] sm:$0xff] %v744_v10  ;;  %375 = vst [vmem:[#allocation2 + $0xcd8] sm:$0xff] %v744_v10  ;;  %v310_v43 = vsel %vm307_vm2, 0.0, %v277_v39  ;;  %v311_v44 = vsel %vm307_vm2, 0.0, %v278_v40  ;;  %v226_v46 = vpop.permute.xlu0 %225  ;;  %v247_v47 = vsel %vm241_vm0, 0.0, %v228_v45  ;;  %v256_v48 = vsel %vm250_vm1, %v228_v45, 0.0 }
  0x7e   :  { %376 = vst [vmem:[#allocation2 + $0xce0] sm:$0xff] %v744_v10  ;;  %377 = vst [vmem:[#allocation2 + $0xce8] sm:$0xff] %v744_v10  ;;  %v246_v49 = vsel %vm241_vm0, 0.0, %v226_v46  ;;  %v255_v50 = vsel %vm250_vm1, %v226_v46, 0.0  ;;  %v285_v51 = vrot.slane %v247_v47, 7  ;;  %v286_v52 = vrot.slane %v256_v48, 7 }
  0x7f   :  { %380 = vst [vmem:[#allocation2 + $0xec0] sm:$0xff] %v744_v10  ;;  %381 = vst [vmem:[#allocation2 + $0xec8] sm:$0xff] %v744_v10  ;;  %v283_v53 = vrot.slane %v246_v49, 7  ;;  %v284_v54 = vrot.slane %v255_v50, 7 }
  0x80   :  { %382 = vst [vmem:[#allocation2 + $0xed0] sm:$0xff] %v744_v10  ;;  %383 = vst [vmem:[#allocation2 + $0xed8] sm:$0xff] %v744_v10  ;;  %v318_v55 = vsel %vm307_vm2, 0.0, %v285_v51  ;;  %v319_v56 = vsel %vm307_vm2, 0.0, %v286_v52  ;;  %v232_v59 = vpop.permute.xlu1 %231 }
  0x81   :  { %384 = vst [vmem:[#allocation2 + $0xee0] sm:$0xff] %v744_v10  ;;  %385 = vst [vmem:[#allocation2 + $0xee8] sm:$0xff] %v744_v10  ;;  %v316_v57 = vsel %vm307_vm2, 0.0, %v283_v53  ;;  %v317_v58 = vsel %vm307_vm2, 0.0, %v284_v54  ;;  %v230_v60 = vpop.permute.xlu0 %229  ;;  %v249_v61 = vsel %vm241_vm0, 0.0, %v232_v59  ;;  %v258_v62 = vsel %vm250_vm1, %v232_v59, 0.0 }
  0x82   :  { %446 = vst [vmem:[#allocation2 + $0x110] sm:$0xff] %v744_v10  ;;  %447 = vst [vmem:[#allocation2 + $0x118] sm:$0xff] %v744_v10  ;;  %v248_v63 = vsel %vm241_vm0, 0.0, %v230_v60  ;;  %v257_v0 = vsel %vm250_vm1, %v230_v60, 0.0  ;;  %v289_v1 = vrot.slane %v249_v61, 7  ;;  %v290_v2 = vrot.slane %v258_v62, 7 }
  0x83   :  { %448 = vst [vmem:[#allocation2 + $0x120] sm:$0xff] %v744_v10  ;;  %449 = vst [vmem:[#allocation2 + $0x128] sm:$0xff] %v744_v10  ;;  %v287_v3 = vrot.slane %v248_v63, 7  ;;  %v288_v4 = vrot.slane %v257_v0, 7 }
  0x84   :  { %450 = vst [vmem:[#allocation2 + $0x130] sm:$0xff] %v744_v10  ;;  %451 = vst [vmem:[#allocation2 + $0x138] sm:$0xff] %v744_v10  ;;  %v322_v5 = vsel %vm307_vm2, 0.0, %v289_v1  ;;  %v323_v6 = vsel %vm307_vm2, 0.0, %v290_v2  ;;  %v407_v9 = vpop.permute.xlu1 %406 }
  0x85   :  { %454 = vst [vmem:[#allocation2 + $0x310] sm:$0xff] %v744_v10  ;;  %455 = vst [vmem:[#allocation2 + $0x318] sm:$0xff] %v744_v10  ;;  %v320_v7 = vsel %vm307_vm2, 0.0, %v287_v3  ;;  %v321_v8 = vsel %vm307_vm2, 0.0, %v288_v4  ;;  %v429_v11 = vsel %vm241_vm0, 0.0, %v407_v9  ;;  %v437_v12 = vsel %vm250_vm1, %v407_v9, 0.0 }
  0x86   :  { %456 = vst [vmem:[#allocation2 + $0x320] sm:$0xff] %v744_v10  ;;  %457 = vst [vmem:[#allocation2 + $0x328] sm:$0xff] %v744_v10 }
  0x87   :  { %458 = vst [vmem:[#allocation2 + $0x330] sm:$0xff] %v744_v10  ;;  %459 = vst [vmem:[#allocation2 + $0x338] sm:$0xff] %v744_v10 }
  0x88   :  { %462 = vst [vmem:[#allocation2 + $0x510] sm:$0xff] %v744_v10  ;;  %463 = vst [vmem:[#allocation2 + $0x518] sm:$0xff] %v744_v10  ;;  %v411_v15 = vpop.permute.xlu1 %410 }
  0x89   :  { %464 = vst [vmem:[#allocation2 + $0x520] sm:$0xff] %v744_v10  ;;  %465 = vst [vmem:[#allocation2 + $0x528] sm:$0xff] %v744_v10  ;;  %v431_v17 = vsel %vm241_vm0, 0.0, %v411_v15  ;;  %v439_v18 = vsel %vm250_vm1, %v411_v15, 0.0 }
  0x8a   :  { %466 = vst [vmem:[#allocation2 + $0x530] sm:$0xff] %v744_v10  ;;  %467 = vst [vmem:[#allocation2 + $0x538] sm:$0xff] %v744_v10 }
  0x8b   :  { %470 = vst [vmem:[#allocation2 + $0x710] sm:$0xff] %v744_v10  ;;  %471 = vst [vmem:[#allocation2 + $0x718] sm:$0xff] %v744_v10 }
  0x8c   :  { %472 = vst [vmem:[#allocation2 + $0x720] sm:$0xff] %v744_v10  ;;  %473 = vst [vmem:[#allocation2 + $0x728] sm:$0xff] %v744_v10  ;;  %v415_v21 = vpop.permute.xlu1 %414 }
  0x8d   :  { %474 = vst [vmem:[#allocation2 + $0x730] sm:$0xff] %v744_v10  ;;  %475 = vst [vmem:[#allocation2 + $0x738] sm:$0xff] %v744_v10  ;;  %v433_v23 = vsel %vm241_vm0, 0.0, %v415_v21  ;;  %v441_v24 = vsel %vm250_vm1, %v415_v21, 0.0 }
  0x8e   :  { %478 = vst [vmem:[#allocation2 + $0x910] sm:$0xff] %v744_v10  ;;  %479 = vst [vmem:[#allocation2 + $0x918] sm:$0xff] %v744_v10 }
  0x8f   :  { %480 = vst [vmem:[#allocation2 + $0x920] sm:$0xff] %v744_v10  ;;  %481 = vst [vmem:[#allocation2 + $0x928] sm:$0xff] %v744_v10 }
  0x90   :  { %482 = vst [vmem:[#allocation2 + $0x930] sm:$0xff] %v744_v10  ;;  %483 = vst [vmem:[#allocation2 + $0x938] sm:$0xff] %v744_v10 }
  0x91   :  { %486 = vst [vmem:[#allocation2 + $0xb10] sm:$0xff] %v744_v10  ;;  %487 = vst [vmem:[#allocation2 + $0xb18] sm:$0xff] %v744_v10 }
  0x92   :  { %488 = vst [vmem:[#allocation2 + $0xb20] sm:$0xff] %v744_v10  ;;  %489 = vst [vmem:[#allocation2 + $0xb28] sm:$0xff] %v744_v10 }
  0x93   :  { %490 = vst [vmem:[#allocation2 + $0xb30] sm:$0xff] %v744_v10  ;;  %491 = vst [vmem:[#allocation2 + $0xb38] sm:$0xff] %v744_v10 }
  0x94   :  { %494 = vst [vmem:[#allocation2 + $0xd10] sm:$0xff] %v744_v10  ;;  %495 = vst [vmem:[#allocation2 + $0xd18] sm:$0xff] %v744_v10 }
  0x95   :  { %496 = vst [vmem:[#allocation2 + $0xd20] sm:$0xff] %v744_v10  ;;  %497 = vst [vmem:[#allocation2 + $0xd28] sm:$0xff] %v744_v10 }
  0x96   :  { %498 = vst [vmem:[#allocation2 + $0xd30] sm:$0xff] %v744_v10  ;;  %499 = vst [vmem:[#allocation2 + $0xd38] sm:$0xff] %v744_v10 }
  0x97   :  { %502 = vst [vmem:[#allocation2 + $0xf10] sm:$0xff] %v744_v10  ;;  %503 = vst [vmem:[#allocation2 + $0xf18] sm:$0xff] %v744_v10 }
  0x98   :  { %504 = vst [vmem:[#allocation2 + $0xf20] sm:$0xff] %v744_v10  ;;  %505 = vst [vmem:[#allocation2 + $0xf28] sm:$0xff] %v744_v10 }
  0x99   :  { %506 = vst [vmem:[#allocation2 + $0xf30] sm:$0xff] %v744_v10  ;;  %507 = vst [vmem:[#allocation2 + $0xf38] sm:$0xff] %v744_v10 }
  0x9a   :  { %508 = vst [vmem:[#allocation2 + $0x140] sm:$0xff] %v744_v10  ;;  %509 = vst [vmem:[#allocation2 + $0x148] sm:$0xff] %v744_v10 }
  0x9b   :  { %510 = vst [vmem:[#allocation2 + $0x150] sm:$0xff] %v744_v10  ;;  %511 = vst [vmem:[#allocation2 + $0x158] sm:$0xff] %v744_v10 }
  0x9c   :  { %512 = vst [vmem:[#allocation2 + $0x160] sm:$0xff] %v744_v10  ;;  %513 = vst [vmem:[#allocation2 + $0x168] sm:$0xff] %v744_v10 }
  0x9d   :  { %514 = vst [vmem:[#allocation2 + $0x170] sm:$0xff] %v744_v10  ;;  %515 = vst [vmem:[#allocation2 + $0x178] sm:$0xff] %v744_v10 }
  0x9e   :  { %516 = vst [vmem:[#allocation2 + $0x340] sm:$0xff] %v744_v10  ;;  %517 = vst [vmem:[#allocation2 + $0x348] sm:$0xff] %v744_v10 }
  0x9f   :  { %518 = vst [vmem:[#allocation2 + $0x350] sm:$0xff] %v744_v10  ;;  %519 = vst [vmem:[#allocation2 + $0x358] sm:$0xff] %v744_v10 }
  0xa0   :  { %520 = vst [vmem:[#allocation2 + $0x360] sm:$0xff] %v744_v10  ;;  %521 = vst [vmem:[#allocation2 + $0x368] sm:$0xff] %v744_v10 }
  0xa1   :  { %522 = vst [vmem:[#allocation2 + $0x370] sm:$0xff] %v744_v10  ;;  %523 = vst [vmem:[#allocation2 + $0x378] sm:$0xff] %v744_v10 }
  0xa2   :  { %524 = vst [vmem:[#allocation2 + $0x540] sm:$0xff] %v744_v10  ;;  %525 = vst [vmem:[#allocation2 + $0x548] sm:$0xff] %v744_v10 }
  0xa3   :  { %526 = vst [vmem:[#allocation2 + $0x550] sm:$0xff] %v744_v10  ;;  %527 = vst [vmem:[#allocation2 + $0x558] sm:$0xff] %v744_v10 }
  0xa4   :  { %528 = vst [vmem:[#allocation2 + $0x560] sm:$0xff] %v744_v10  ;;  %529 = vst [vmem:[#allocation2 + $0x568] sm:$0xff] %v744_v10 }
  0xa5   :  { %530 = vst [vmem:[#allocation2 + $0x570] sm:$0xff] %v744_v10  ;;  %531 = vst [vmem:[#allocation2 + $0x578] sm:$0xff] %v744_v10 }
  0xa6   :  { %532 = vst [vmem:[#allocation2 + $0x740] sm:$0xff] %v744_v10  ;;  %533 = vst [vmem:[#allocation2 + $0x748] sm:$0xff] %v744_v10 }
  0xa7   :  { %534 = vst [vmem:[#allocation2 + $0x750] sm:$0xff] %v744_v10  ;;  %535 = vst [vmem:[#allocation2 + $0x758] sm:$0xff] %v744_v10 }
  0xa8   :  { %536 = vst [vmem:[#allocation2 + $0x760] sm:$0xff] %v744_v10  ;;  %537 = vst [vmem:[#allocation2 + $0x768] sm:$0xff] %v744_v10 }
  0xa9   :  { %538 = vst [vmem:[#allocation2 + $0x770] sm:$0xff] %v744_v10  ;;  %539 = vst [vmem:[#allocation2 + $0x778] sm:$0xff] %v744_v10 }
  0xaa   :  { %540 = vst [vmem:[#allocation2 + $0x940] sm:$0xff] %v744_v10  ;;  %541 = vst [vmem:[#allocation2 + $0x948] sm:$0xff] %v744_v10 }
  0xab   :  { %542 = vst [vmem:[#allocation2 + $0x950] sm:$0xff] %v744_v10  ;;  %543 = vst [vmem:[#allocation2 + $0x958] sm:$0xff] %v744_v10 }
  0xac   :  { %544 = vst [vmem:[#allocation2 + $0x960] sm:$0xff] %v744_v10  ;;  %545 = vst [vmem:[#allocation2 + $0x968] sm:$0xff] %v744_v10 }
  0xad   :  { %546 = vst [vmem:[#allocation2 + $0x970] sm:$0xff] %v744_v10  ;;  %547 = vst [vmem:[#allocation2 + $0x978] sm:$0xff] %v744_v10 }
  0xae   :  { %548 = vst [vmem:[#allocation2 + $0xb40] sm:$0xff] %v744_v10  ;;  %549 = vst [vmem:[#allocation2 + $0xb48] sm:$0xff] %v744_v10 }
  0xaf   :  { %550 = vst [vmem:[#allocation2 + $0xb50] sm:$0xff] %v744_v10  ;;  %551 = vst [vmem:[#allocation2 + $0xb58] sm:$0xff] %v744_v10 }
  0xb0   :  { %552 = vst [vmem:[#allocation2 + $0xb60] sm:$0xff] %v744_v10  ;;  %553 = vst [vmem:[#allocation2 + $0xb68] sm:$0xff] %v744_v10 }
  0xb1   :  { %554 = vst [vmem:[#allocation2 + $0xb70] sm:$0xff] %v744_v10  ;;  %555 = vst [vmem:[#allocation2 + $0xb78] sm:$0xff] %v744_v10 }
  0xb2   :  { %556 = vst [vmem:[#allocation2 + $0xd40] sm:$0xff] %v744_v10  ;;  %557 = vst [vmem:[#allocation2 + $0xd48] sm:$0xff] %v744_v10 }
  0xb3   :  { %558 = vst [vmem:[#allocation2 + $0xd50] sm:$0xff] %v744_v10  ;;  %559 = vst [vmem:[#allocation2 + $0xd58] sm:$0xff] %v744_v10 }
  0xb4   :  { %560 = vst [vmem:[#allocation2 + $0xd60] sm:$0xff] %v744_v10  ;;  %561 = vst [vmem:[#allocation2 + $0xd68] sm:$0xff] %v744_v10 }
  0xb5   :  { %562 = vst [vmem:[#allocation2 + $0xd70] sm:$0xff] %v744_v10  ;;  %563 = vst [vmem:[#allocation2 + $0xd78] sm:$0xff] %v744_v10 }
  0xb6   :  { %564 = vst [vmem:[#allocation2 + $0xf40] sm:$0xff] %v744_v10  ;;  %565 = vst [vmem:[#allocation2 + $0xf48] sm:$0xff] %v744_v10 }
  0xb7   :  { %566 = vst [vmem:[#allocation2 + $0xf50] sm:$0xff] %v744_v10  ;;  %567 = vst [vmem:[#allocation2 + $0xf58] sm:$0xff] %v744_v10 }
  0xb8   :  { %568 = vst [vmem:[#allocation2 + $0xf60] sm:$0xff] %v744_v10  ;;  %569 = vst [vmem:[#allocation2 + $0xf68] sm:$0xff] %v744_v10 }
  0xb9   :  { %570 = vst [vmem:[#allocation2 + $0xf70] sm:$0xff] %v744_v10  ;;  %571 = vst [vmem:[#allocation2 + $0xf78] sm:$0xff] %v744_v10 }
  0xba   :  { %572 = vst [vmem:[#allocation2 + $0x180] sm:$0xff] %v744_v10  ;;  %573 = vst [vmem:[#allocation2 + $0x188] sm:$0xff] %v744_v10 }
  0xbb   :  { %574 = vst [vmem:[#allocation2 + $0x190] sm:$0xff] %v744_v10  ;;  %575 = vst [vmem:[#allocation2 + $0x198] sm:$0xff] %v744_v10 }
  0xbc   :  { %576 = vst [vmem:[#allocation2 + $0x1a0] sm:$0xff] %v744_v10  ;;  %577 = vst [vmem:[#allocation2 + $0x1a8] sm:$0xff] %v744_v10 }
  0xbd   :  { %578 = vst [vmem:[#allocation2 + $0x1b0] sm:$0xff] %v744_v10  ;;  %579 = vst [vmem:[#allocation2 + $0x1b8] sm:$0xff] %v744_v10 }
  0xbe   :  { %580 = vst [vmem:[#allocation2 + $0x380] sm:$0xff] %v744_v10  ;;  %581 = vst [vmem:[#allocation2 + $0x388] sm:$0xff] %v744_v10 }
  0xbf   :  { %582 = vst [vmem:[#allocation2 + $0x390] sm:$0xff] %v744_v10  ;;  %583 = vst [vmem:[#allocation2 + $0x398] sm:$0xff] %v744_v10 }
  0xc0   :  { %584 = vst [vmem:[#allocation2 + $0x3a0] sm:$0xff] %v744_v10  ;;  %585 = vst [vmem:[#allocation2 + $0x3a8] sm:$0xff] %v744_v10 }
  0xc1   :  { %586 = vst [vmem:[#allocation2 + $0x3b0] sm:$0xff] %v744_v10  ;;  %587 = vst [vmem:[#allocation2 + $0x3b8] sm:$0xff] %v744_v10 }
  0xc2   :  { %588 = vst [vmem:[#allocation2 + $0x580] sm:$0xff] %v744_v10  ;;  %589 = vst [vmem:[#allocation2 + $0x588] sm:$0xff] %v744_v10 }
  0xc3   :  { %590 = vst [vmem:[#allocation2 + $0x590] sm:$0xff] %v744_v10  ;;  %591 = vst [vmem:[#allocation2 + $0x598] sm:$0xff] %v744_v10 }
  0xc4   :  { %592 = vst [vmem:[#allocation2 + $0x5a0] sm:$0xff] %v744_v10  ;;  %593 = vst [vmem:[#allocation2 + $0x5a8] sm:$0xff] %v744_v10 }
  0xc5   :  { %594 = vst [vmem:[#allocation2 + $0x5b0] sm:$0xff] %v744_v10  ;;  %595 = vst [vmem:[#allocation2 + $0x5b8] sm:$0xff] %v744_v10 }
  0xc6   :  { %596 = vst [vmem:[#allocation2 + $0x780] sm:$0xff] %v744_v10  ;;  %597 = vst [vmem:[#allocation2 + $0x788] sm:$0xff] %v744_v10 }
  0xc7   :  { %598 = vst [vmem:[#allocation2 + $0x790] sm:$0xff] %v744_v10  ;;  %599 = vst [vmem:[#allocation2 + $0x798] sm:$0xff] %v744_v10 }
  0xc8   :  { %600 = vst [vmem:[#allocation2 + $0x7a0] sm:$0xff] %v744_v10  ;;  %601 = vst [vmem:[#allocation2 + $0x7a8] sm:$0xff] %v744_v10 }
  0xc9   :  { %602 = vst [vmem:[#allocation2 + $0x7b0] sm:$0xff] %v744_v10  ;;  %603 = vst [vmem:[#allocation2 + $0x7b8] sm:$0xff] %v744_v10 }
  0xca   :  { %604 = vst [vmem:[#allocation2 + $0x980] sm:$0xff] %v744_v10  ;;  %605 = vst [vmem:[#allocation2 + $0x988] sm:$0xff] %v744_v10 }
  0xcb   :  { %606 = vst [vmem:[#allocation2 + $0x990] sm:$0xff] %v744_v10  ;;  %607 = vst [vmem:[#allocation2 + $0x998] sm:$0xff] %v744_v10 }
  0xcc   :  { %608 = vst [vmem:[#allocation2 + $0x9a0] sm:$0xff] %v744_v10  ;;  %609 = vst [vmem:[#allocation2 + $0x9a8] sm:$0xff] %v744_v10 }
  0xcd   :  { %610 = vst [vmem:[#allocation2 + $0x9b0] sm:$0xff] %v744_v10  ;;  %611 = vst [vmem:[#allocation2 + $0x9b8] sm:$0xff] %v744_v10 }
  0xce   :  { %612 = vst [vmem:[#allocation2 + $0xb80] sm:$0xff] %v744_v10  ;;  %613 = vst [vmem:[#allocation2 + $0xb88] sm:$0xff] %v744_v10 }
  0xcf   :  { %614 = vst [vmem:[#allocation2 + $0xb90] sm:$0xff] %v744_v10  ;;  %615 = vst [vmem:[#allocation2 + $0xb98] sm:$0xff] %v744_v10 }
  0xd0   :  { %616 = vst [vmem:[#allocation2 + $0xba0] sm:$0xff] %v744_v10  ;;  %617 = vst [vmem:[#allocation2 + $0xba8] sm:$0xff] %v744_v10 }
  0xd1   :  { %618 = vst [vmem:[#allocation2 + $0xbb0] sm:$0xff] %v744_v10  ;;  %619 = vst [vmem:[#allocation2 + $0xbb8] sm:$0xff] %v744_v10 }
  0xd2   :  { %620 = vst [vmem:[#allocation2 + $0xd80] sm:$0xff] %v744_v10  ;;  %621 = vst [vmem:[#allocation2 + $0xd88] sm:$0xff] %v744_v10 }
  0xd3   :  { %622 = vst [vmem:[#allocation2 + $0xd90] sm:$0xff] %v744_v10  ;;  %623 = vst [vmem:[#allocation2 + $0xd98] sm:$0xff] %v744_v10 }
  0xd4   :  { %624 = vst [vmem:[#allocation2 + $0xda0] sm:$0xff] %v744_v10  ;;  %625 = vst [vmem:[#allocation2 + $0xda8] sm:$0xff] %v744_v10 }
  0xd5   :  { %626 = vst [vmem:[#allocation2 + $0xdb0] sm:$0xff] %v744_v10  ;;  %627 = vst [vmem:[#allocation2 + $0xdb8] sm:$0xff] %v744_v10 }
  0xd6   :  { %628 = vst [vmem:[#allocation2 + $0xf80] sm:$0xff] %v744_v10  ;;  %629 = vst [vmem:[#allocation2 + $0xf88] sm:$0xff] %v744_v10 }
  0xd7   :  { %630 = vst [vmem:[#allocation2 + $0xf90] sm:$0xff] %v744_v10  ;;  %631 = vst [vmem:[#allocation2 + $0xf98] sm:$0xff] %v744_v10 }
  0xd8   :  { %632 = vst [vmem:[#allocation2 + $0xfa0] sm:$0xff] %v744_v10  ;;  %633 = vst [vmem:[#allocation2 + $0xfa8] sm:$0xff] %v744_v10 }
  0xd9   :  { %634 = vst [vmem:[#allocation2 + $0xfb0] sm:$0xff] %v744_v10  ;;  %635 = vst [vmem:[#allocation2 + $0xfb8] sm:$0xff] %v744_v10 }
  0xda   :  { %636 = vst [vmem:[#allocation2 + $0x1c0] sm:$0xff] %v744_v10  ;;  %637 = vst [vmem:[#allocation2 + $0x1c8] sm:$0xff] %v744_v10 }
  0xdb   :  { %638 = vst [vmem:[#allocation2 + $0x1d0] sm:$0xff] %v744_v10  ;;  %639 = vst [vmem:[#allocation2 + $0x1d8] sm:$0xff] %v744_v10 }
  0xdc   :  { %640 = vst [vmem:[#allocation2 + $0x1e0] sm:$0xff] %v744_v10  ;;  %641 = vst [vmem:[#allocation2 + $0x1e8] sm:$0xff] %v744_v10 }
  0xdd   :  { %642 = vst [vmem:[#allocation2 + $0x1f0] sm:$0xff] %v744_v10  ;;  %643 = vst [vmem:[#allocation2 + $0x1f8] sm:$0xff] %v744_v10 }
  0xde   :  { %644 = vst [vmem:[#allocation2 + $0x3c0] sm:$0xff] %v744_v10  ;;  %645 = vst [vmem:[#allocation2 + $0x3c8] sm:$0xff] %v744_v10 }
  0xdf   :  { %646 = vst [vmem:[#allocation2 + $0x3d0] sm:$0xff] %v744_v10  ;;  %647 = vst [vmem:[#allocation2 + $0x3d8] sm:$0xff] %v744_v10 }
  0xe0   :  { %648 = vst [vmem:[#allocation2 + $0x3e0] sm:$0xff] %v744_v10  ;;  %649 = vst [vmem:[#allocation2 + $0x3e8] sm:$0xff] %v744_v10 }
  0xe1   :  { %650 = vst [vmem:[#allocation2 + $0x3f0] sm:$0xff] %v744_v10  ;;  %651 = vst [vmem:[#allocation2 + $0x3f8] sm:$0xff] %v744_v10 }
  0xe2   :  { %652 = vst [vmem:[#allocation2 + $0x5c0] sm:$0xff] %v744_v10  ;;  %653 = vst [vmem:[#allocation2 + $0x5c8] sm:$0xff] %v744_v10 }
  0xe3   :  { %654 = vst [vmem:[#allocation2 + $0x5d0] sm:$0xff] %v744_v10  ;;  %655 = vst [vmem:[#allocation2 + $0x5d8] sm:$0xff] %v744_v10 }
  0xe4   :  { %656 = vst [vmem:[#allocation2 + $0x5e0] sm:$0xff] %v744_v10  ;;  %657 = vst [vmem:[#allocation2 + $0x5e8] sm:$0xff] %v744_v10 }
  0xe5   :  { %658 = vst [vmem:[#allocation2 + $0x5f0] sm:$0xff] %v744_v10  ;;  %659 = vst [vmem:[#allocation2 + $0x5f8] sm:$0xff] %v744_v10 }
  0xe6   :  { %660 = vst [vmem:[#allocation2 + $0x7c0] sm:$0xff] %v744_v10  ;;  %661 = vst [vmem:[#allocation2 + $0x7c8] sm:$0xff] %v744_v10 }
  0xe7   :  { %662 = vst [vmem:[#allocation2 + $0x7d0] sm:$0xff] %v744_v10  ;;  %663 = vst [vmem:[#allocation2 + $0x7d8] sm:$0xff] %v744_v10 }
  0xe8   :  { %664 = vst [vmem:[#allocation2 + $0x7e0] sm:$0xff] %v744_v10  ;;  %665 = vst [vmem:[#allocation2 + $0x7e8] sm:$0xff] %v744_v10 }
  0xe9   :  { %666 = vst [vmem:[#allocation2 + $0x7f0] sm:$0xff] %v744_v10  ;;  %667 = vst [vmem:[#allocation2 + $0x7f8] sm:$0xff] %v744_v10 }
  0xea   :  { %668 = vst [vmem:[#allocation2 + $0x9c0] sm:$0xff] %v744_v10  ;;  %669 = vst [vmem:[#allocation2 + $0x9c8] sm:$0xff] %v744_v10 }
  0xeb   :  { %670 = vst [vmem:[#allocation2 + $0x9d0] sm:$0xff] %v744_v10  ;;  %671 = vst [vmem:[#allocation2 + $0x9d8] sm:$0xff] %v744_v10 }
  0xec   :  { %672 = vst [vmem:[#allocation2 + $0x9e0] sm:$0xff] %v744_v10  ;;  %673 = vst [vmem:[#allocation2 + $0x9e8] sm:$0xff] %v744_v10 }
  0xed   :  { %674 = vst [vmem:[#allocation2 + $0x9f0] sm:$0xff] %v744_v10  ;;  %675 = vst [vmem:[#allocation2 + $0x9f8] sm:$0xff] %v744_v10 }
  0xee   :  { %676 = vst [vmem:[#allocation2 + $0xbc0] sm:$0xff] %v744_v10  ;;  %677 = vst [vmem:[#allocation2 + $0xbc8] sm:$0xff] %v744_v10 }
  0xef   :  { %678 = vst [vmem:[#allocation2 + $0xbd0] sm:$0xff] %v744_v10  ;;  %679 = vst [vmem:[#allocation2 + $0xbd8] sm:$0xff] %v744_v10 }
  0xf0   :  { %680 = vst [vmem:[#allocation2 + $0xbe0] sm:$0xff] %v744_v10  ;;  %681 = vst [vmem:[#allocation2 + $0xbe8] sm:$0xff] %v744_v10 }
  0xf1   :  { %682 = vst [vmem:[#allocation2 + $0xbf0] sm:$0xff] %v744_v10  ;;  %683 = vst [vmem:[#allocation2 + $0xbf8] sm:$0xff] %v744_v10 }
  0xf2   :  { %684 = vst [vmem:[#allocation2 + $0xdc0] sm:$0xff] %v744_v10  ;;  %685 = vst [vmem:[#allocation2 + $0xdc8] sm:$0xff] %v744_v10 }
  0xf3   :  { %686 = vst [vmem:[#allocation2 + $0xdd0] sm:$0xff] %v744_v10  ;;  %687 = vst [vmem:[#allocation2 + $0xdd8] sm:$0xff] %v744_v10 }
  0xf4   :  { %688 = vst [vmem:[#allocation2 + $0xde0] sm:$0xff] %v744_v10  ;;  %689 = vst [vmem:[#allocation2 + $0xde8] sm:$0xff] %v744_v10 }
  0xf5   :  { %690 = vst [vmem:[#allocation2 + $0xdf0] sm:$0xff] %v744_v10  ;;  %691 = vst [vmem:[#allocation2 + $0xdf8] sm:$0xff] %v744_v10 }
  0xf6   :  { %692 = vst [vmem:[#allocation2 + $0xfc0] sm:$0xff] %v744_v10  ;;  %693 = vst [vmem:[#allocation2 + $0xfc8] sm:$0xff] %v744_v10 }
  0xf7   :  { %694 = vst [vmem:[#allocation2 + $0xfd0] sm:$0xff] %v744_v10  ;;  %695 = vst [vmem:[#allocation2 + $0xfd8] sm:$0xff] %v744_v10 }
  0xf8   :  { %696 = vst [vmem:[#allocation2 + $0xfe0] sm:$0xff] %v744_v10  ;;  %697 = vst [vmem:[#allocation2 + $0xfe8] sm:$0xff] %v744_v10 }
  0xf9   :  { %698 = vst [vmem:[#allocation2 + $0xff0] sm:$0xff] %v744_v10  ;;  %699 = vst [vmem:[#allocation2 + $0xff8] sm:$0xff] %v744_v10  ;;  %v405_v10 = vpop.permute.xlu0 %404 }
  0xfa   :  { %346 = vst [vmem:[#allocation2 + $0x4f0] sm:$0xff] %v312_v27  ;;  %347 = vst [vmem:[#allocation2 + $0x4f8] sm:$0xff] %v313_v28  ;;  %v428_v13 = vsel %vm241_vm0, 0.0, %v405_v10  ;;  %v436_v14 = vsel %vm250_vm1, %v405_v10, 0.0  ;;  %v419_v27 = vpop.permute.xlu1 %418 }
  0xfb   :  { %330 = vst [vmem:[#allocation2 + $0xf0] sm:$0xff] %v308_v29  ;;  %331 = vst [vmem:[#allocation2 + $0xf8] sm:$0xff] %v309_v30  ;;  %v435_v29 = vsel %vm241_vm0, 0.0, %v419_v27  ;;  %v443_v30 = vsel %vm250_vm1, %v419_v27, 0.0 }
  0xfc   :  { %354 = vst [vmem:[#allocation2 + $0x6f0] sm:$0xff] %v314_v41  ;;  %355 = vst [vmem:[#allocation2 + $0x6f8] sm:$0xff] %v315_v42 }
  0xfd   :  { %338 = vst [vmem:[#allocation2 + $0x2f0] sm:$0xff] %v310_v43  ;;  %339 = vst [vmem:[#allocation2 + $0x2f8] sm:$0xff] %v311_v44  ;;  %v409_v16 = vpop.permute.xlu0 %408 }
  0xfe   :  { %370 = vst [vmem:[#allocation2 + $0xaf0] sm:$0xff] %v318_v55  ;;  %371 = vst [vmem:[#allocation2 + $0xaf8] sm:$0xff] %v319_v56  ;;  %v430_v19 = vsel %vm241_vm0, 0.0, %v409_v16  ;;  %v438_v20 = vsel %vm250_vm1, %v409_v16, 0.0 }
  0xff   :  { %362 = vst [vmem:[#allocation2 + $0x8f0] sm:$0xff] %v316_v57  ;;  %363 = vst [vmem:[#allocation2 + $0x8f8] sm:$0xff] %v317_v58 }
 0x100   :  { %386 = vst [vmem:[#allocation2 + $0xef0] sm:$0xff] %v322_v5  ;;  %387 = vst [vmem:[#allocation2 + $0xef8] sm:$0xff] %v323_v6 }
 0x101   :  { %378 = vst [vmem:[#allocation2 + $0xcf0] sm:$0xff] %v320_v7  ;;  %379 = vst [vmem:[#allocation2 + $0xcf8] sm:$0xff] %v321_v8  ;;  %v413_v22 = vpop.permute.xlu0 %412 }
 0x102   :  { %452 = vst [vmem:[#allocation2 + $0x300] sm:$0xff] %v429_v11  ;;  %453 = vst [vmem:[#allocation2 + $0x308] sm:$0xff] %v437_v12  ;;  %v432_v25 = vsel %vm241_vm0, 0.0, %v413_v22  ;;  %v440_v26 = vsel %vm250_vm1, %v413_v22, 0.0 }
 0x103   :  { %444 = vst [vmem:[#allocation2 + $0x100] sm:$0xff] %v428_v13  ;;  %445 = vst [vmem:[#allocation2 + $0x108] sm:$0xff] %v436_v14 }
 0x104   :  { %468 = vst [vmem:[#allocation2 + $0x700] sm:$0xff] %v431_v17  ;;  %469 = vst [vmem:[#allocation2 + $0x708] sm:$0xff] %v439_v18 }
 0x105   :  { %460 = vst [vmem:[#allocation2 + $0x500] sm:$0xff] %v430_v19  ;;  %461 = vst [vmem:[#allocation2 + $0x508] sm:$0xff] %v438_v20  ;;  %v417_v28 = vpop.permute.xlu0 %416 }
 0x106   :  { %484 = vst [vmem:[#allocation2 + $0xb00] sm:$0xff] %v433_v23  ;;  %485 = vst [vmem:[#allocation2 + $0xb08] sm:$0xff] %v441_v24  ;;  %v434_v31 = vsel %vm241_vm0, 0.0, %v417_v28  ;;  %v442_v32 = vsel %vm250_vm1, %v417_v28, 0.0 }
 0x107   :  { %476 = vst [vmem:[#allocation2 + $0x900] sm:$0xff] %v432_v25  ;;  %477 = vst [vmem:[#allocation2 + $0x908] sm:$0xff] %v440_v26 }
 0x108   :  { %500 = vst [vmem:[#allocation2 + $0xf00] sm:$0xff] %v435_v29  ;;  %501 = vst [vmem:[#allocation2 + $0xf08] sm:$0xff] %v443_v30 }
 0x109   :  { %492 = vst [vmem:[#allocation2 + $0xd00] sm:$0xff] %v434_v31  ;;  %493 = vst [vmem:[#allocation2 + $0xd08] sm:$0xff] %v442_v32 }
 0x10a   :  { %732 = shalt.err (!%p729_p4)
}
 0x10b   :  { %s746_s12 = smov 256   ;;  %s747_s13 = smov 16  }
 0x10c   :  { %711 = dma.vmem_to_hbm [thread:$0]  %s706_s10, 65536, %s1354_s1, [#allocation3], %s746_s12, %s746_s12, %s747_s13  }
 0x10d   :  { %741 = dma.done.wait [#allocation3], 65536  }
 0x10e   :  { %742 = vsyncadd [#allocation3], 4294901760 }
 0x10f   :  { %715 = vsyncpa [#allocation3], 1 }

</bundles_post_ra>
